<compile_context>
chip_gen: v5e
topology: v5e:2x2
jax: 0.10.0
libtpu: 0.0.40
codegen_flags: <defaults>
</compile_context>

<pallas_src>
import functools

import jax
import jax.numpy as jnp
from jax.experimental import pallas as pl
from jax.experimental.pallas import tpu as pltpu


def _round_up(x, m):
    return (x + m - 1) // m * m


def _sage_kernel(src_ref, tgt_ref, x_ref, wl_ref, wr_ref, bl_ref,
                 out_ref, acc_ref, *, ones_col):
    # src_ref/tgt_ref: (1, tile_e) int32 edge endpoints (-1 = padding)
    # x_ref:           (N_pad, F_in_pad) f32, column `ones_col` is all-ones
    # wl_ref/wr_ref:   (F_in_pad, F_out_pad) f32 (zero rows in padding)
    # bl_ref:          (1, F_out_pad) f32
    # out_ref:         (N_pad, F_out_pad) f32 (written only at the last step)
    # acc_ref:         (N_pad, F_in_pad) f32 scratch (neighbor sums + counts)
    step = pl.program_id(0)

    @pl.when(step == 0)
    def _():
        acc_ref[...] = jnp.zeros_like(acc_ref)

    n_pad = x_ref.shape[0]
    tile_e = src_ref.shape[1]

    # One-hot membership built straight from the 2-D id blocks.
    row_iota = jax.lax.broadcasted_iota(jnp.int32, (n_pad, tile_e), 0)
    src_onehot_t = (src_ref[...] == row_iota).astype(jnp.float32)  # S^T: (N, E_t)
    tgt_onehot = (tgt_ref[...] == row_iota).astype(jnp.float32)    # T:   (N, E_t)

    # Gather per-edge source features: (E_t, F) = S @ x  (contract node dim).
    x_src = jax.lax.dot_general(
        src_onehot_t, x_ref[...],
        dimension_numbers=(((0,), (0,)), ((), ())),
        preferred_element_type=jnp.float32)

    # Scatter-add to target nodes.  The ones-column of x rides along, so
    # acc[:, ones_col] accumulates the in-degree (count) of every node.
    acc_ref[...] += jnp.dot(tgt_onehot, x_src,
                            preferred_element_type=jnp.float32)

    @pl.when(step == pl.num_programs(0) - 1)
    def _():
        counts = acc_ref[:, ones_col:ones_col + 1]                 # (N, 1)
        inv = pl.reciprocal(jnp.maximum(counts, 1.0), approx=False)
        agg_mean = acc_ref[...] * inv                              # (N, F_in_pad)
        h = jnp.dot(agg_mean, wl_ref[...],
                    preferred_element_type=jnp.float32)
        h = h + jnp.dot(x_ref[...], wr_ref[...],
                        preferred_element_type=jnp.float32)
        h = h + bl_ref[...]
        out_ref[...] = h.astype(out_ref.dtype)


def sage_layer(x, edge_index, w_l, w_r, b_l, *, tile_e=128):
    """SAGEConv forward.

    x:          [N, F_in] float
    edge_index: [2, E] int (row 0 = source, row 1 = target)
    w_l:        [F_out, F_in]  (applied to the aggregated neighbors, with bias)
    w_r:        [F_out, F_in]  (applied to the root/self features)
    b_l:        [F_out]
    returns     [N, F_out]
    """
    n, f_in = x.shape
    f_out = w_l.shape[0]
    e = edge_index.shape[1]

    n_pad = _round_up(n, 8)
    f_in_pad = _round_up(f_in + 1, 128)   # +1 spare column for fused counts
    f_out_pad = _round_up(f_out, 128)     # lane-dense output stores
    e_pad = _round_up(e, tile_e)

    x_pad = jnp.zeros((n_pad, f_in_pad), jnp.float32)
    x_pad = x_pad.at[:n, :f_in].set(x.astype(jnp.float32))
    x_pad = x_pad.at[:n, f_in].set(1.0)   # ones column -> in-degree via matmul

    wl_pad = jnp.zeros((f_in_pad, f_out_pad), jnp.float32)
    wl_pad = wl_pad.at[:f_in, :f_out].set(w_l.T.astype(jnp.float32))
    wr_pad = jnp.zeros((f_in_pad, f_out_pad), jnp.float32)
    wr_pad = wr_pad.at[:f_in, :f_out].set(w_r.T.astype(jnp.float32))
    bl_pad = jnp.zeros((1, f_out_pad), jnp.float32)
    bl_pad = bl_pad.at[0, :f_out].set(b_l.astype(jnp.float32))

    src = jnp.full((1, e_pad), -1, jnp.int32)
    src = src.at[0, :e].set(edge_index[0].astype(jnp.int32))
    tgt = jnp.full((1, e_pad), -1, jnp.int32)
    tgt = tgt.at[0, :e].set(edge_index[1].astype(jnp.int32))

    kernel = functools.partial(_sage_kernel, ones_col=f_in)

    out_pad = pl.pallas_call(
        kernel,
        out_shape=jax.ShapeDtypeStruct((n_pad, f_out_pad), jnp.float32),
        grid_spec=pltpu.PrefetchScalarGridSpec(
            num_scalar_prefetch=0,
            grid=(e_pad // tile_e,),
            in_specs=[
                pl.BlockSpec((1, tile_e), lambda i: (0, i)),          # src ids
                pl.BlockSpec((1, tile_e), lambda i: (0, i)),          # tgt ids
                pl.BlockSpec((n_pad, f_in_pad), lambda i: (0, 0)),    # x (resident)
                pl.BlockSpec((f_in_pad, f_out_pad), lambda i: (0, 0)),  # W_l
                pl.BlockSpec((f_in_pad, f_out_pad), lambda i: (0, 0)),  # W_r
                pl.BlockSpec((1, f_out_pad), lambda i: (0, 0)),       # b_l
            ],
            out_specs=pl.BlockSpec((n_pad, f_out_pad), lambda i: (0, 0)),
            scratch_shapes=[pltpu.VMEM((n_pad, f_in_pad), jnp.float32)],
        ),
        compiler_params=pltpu.CompilerParams(
            dimension_semantics=("arbitrary",)),   # edge axis is a reduction
    )(src, tgt, x_pad, wl_pad, wr_pad, bl_pad)

    return out_pad[:n, :f_out]


def sage_layer_ref(x, edge_index, w_l, w_r, b_l):
    """Pure-JAX reference (matches torch_geometric SAGEConv default config)."""
    src, tgt = edge_index[0], edge_index[1]
    n = x.shape[0]
    msg = x[src]                                              # (E, F_in)
    sums = jax.ops.segment_sum(msg, tgt, num_segments=n)
    cnt = jax.ops.segment_sum(jnp.ones((edge_index.shape[1],), x.dtype),
                              tgt, num_segments=n)
    agg = sums / jnp.maximum(cnt, 1.0)[:, None]
    return agg @ w_l.T + b_l + x @ w_r.T


if __name__ == "__main__":
    key = jax.random.PRNGKey(0)
    k_x, k_e, k_wl, k_wr, k_b = jax.random.split(key, 5)

    N, F_IN, F_OUT, E = 24, 32, 16, 300   # small graph; 3 pipelined edge tiles
    x = jax.random.normal(k_x, (N, F_IN), dtype=jnp.float32)
    edge_index = jax.random.randint(k_e, (2, E), 0, N).astype(jnp.int32)

    w_l = jax.random.normal(k_wl, (F_OUT, F_IN), dtype=jnp.float32) * 0.1
    w_r = jax.random.normal(k_wr, (F_OUT, F_IN), dtype=jnp.float32) * 0.1
    b_l = jax.random.normal(k_b, (F_OUT,), dtype=jnp.float32) * 0.1

    out = sage_layer(x, edge_index, w_l, w_r, b_l)
    out = jax.block_until_ready(out)

    with jax.default_matmul_precision("highest"):
        ref = sage_layer_ref(x, edge_index, w_l, w_r, b_l)

    assert out.shape == (N, F_OUT)
    err = float(jnp.max(jnp.abs(out - ref)))
    assert jnp.allclose(out, ref, atol=2e-3, rtol=2e-3), f"mismatch vs ref, max err={err}"

    print("KERNEL_OK")
</pallas_src>

<mosaic_0001>
module attributes {stable_mosaic.version = 11 : i64} {
  func.func @_sage_kernel(%arg0: i32, %arg1: memref<1x128xi32, #tpu.memory_space<vmem>>, %arg2: memref<1x128xi32, #tpu.memory_space<vmem>>, %arg3: memref<24x128xf32, #tpu.memory_space<vmem>>, %arg4: memref<128x128xf32, #tpu.memory_space<vmem>>, %arg5: memref<128x128xf32, #tpu.memory_space<vmem>>, %arg6: memref<1x128xf32, #tpu.memory_space<vmem>>, %arg7: memref<24x128xf32, #tpu.memory_space<vmem>>, %arg8: memref<24x128xf32, #tpu.memory_space<vmem>>) attributes {dimension_semantics = [#tpu.dimension_semantics<arbitrary>], iteration_bounds = array<i64: 3>, scalar_prefetch = 0 : i64, scratch_operands = 1 : i64, tpu.core_type = #tpu.core_type<tc>, window_params = [{transform_indices = @transform_0, window_bounds = array<i64: 1, 128>}, {transform_indices = @transform_1, window_bounds = array<i64: 1, 128>}, {pipeline_mode = #tpu.pipeline_mode<synchronous>, transform_indices = @transform_2, window_bounds = array<i64: 24, 128>}, {pipeline_mode = #tpu.pipeline_mode<synchronous>, transform_indices = @transform_3, window_bounds = array<i64: 128, 128>}, {pipeline_mode = #tpu.pipeline_mode<synchronous>, transform_indices = @transform_4, window_bounds = array<i64: 128, 128>}, {pipeline_mode = #tpu.pipeline_mode<synchronous>, transform_indices = @transform_5, window_bounds = array<i64: 1, 128>}, {pipeline_mode = #tpu.pipeline_mode<synchronous>, transform_indices = @transform_6, window_bounds = array<i64: 24, 128>}]} {
    %c0_i32 = arith.constant 0 : i32
    %0 = arith.cmpi eq, %arg0, %c0_i32 : i32
    %1 = arith.extui %0 : i1 to i32
    %c0_i32_0 = arith.constant 0 : i32
    %2 = arith.cmpi ne, %1, %c0_i32_0 : i32
    scf.if %2 {
      %cst_12 = arith.constant 0.000000e+00 : f32
      %23 = vector.broadcast %cst_12 : f32 to vector<24x128xf32>
      %c0_13 = arith.constant 0 : index
      %c0_14 = arith.constant 0 : index
      %24 = vector.load %arg8[%c0_13, %c0_14] : memref<24x128xf32, #tpu.memory_space<vmem>>, vector<24x128xf32>
      tpu.vector_store %arg8[%c0_13, %c0_14], %23 {strides = array<i32>} : memref<24x128xf32, #tpu.memory_space<vmem>>, vector<24x128xf32>,
    } else {
    }
    %3 = tpu.iota {dimensions = array<i32: 0>} : vector<24x128xi32>
    %c0 = arith.constant 0 : index
    %c0_1 = arith.constant 0 : index
    %4 = vector.load %arg1[%c0, %c0_1] : memref<1x128xi32, #tpu.memory_space<vmem>>, vector<1x128xi32>
    %5 = vector.broadcast %4 : vector<1x128xi32> to vector<24x128xi32>
    %6 = arith.cmpi eq, %5, %3 : vector<24x128xi32>
    %7 = arith.extui %6 : vector<24x128xi1> to vector<24x128xi32>
    %8 = arith.sitofp %7 : vector<24x128xi32> to vector<24x128xf32>
    %c0_2 = arith.constant 0 : index
    %c0_3 = arith.constant 0 : index
    %9 = vector.load %arg2[%c0_2, %c0_3] : memref<1x128xi32, #tpu.memory_space<vmem>>, vector<1x128xi32>
    %10 = vector.broadcast %9 : vector<1x128xi32> to vector<24x128xi32>
    %11 = arith.cmpi eq, %10, %3 : vector<24x128xi32>
    %12 = arith.extui %11 : vector<24x128xi1> to vector<24x128xi32>
    %13 = arith.sitofp %12 : vector<24x128xi32> to vector<24x128xf32>
    %c0_4 = arith.constant 0 : index
    %c0_5 = arith.constant 0 : index
    %14 = vector.load %arg3[%c0_4, %c0_5] : memref<24x128xf32, #tpu.memory_space<vmem>>, vector<24x128xf32>
    %cst = arith.constant dense<0.000000e+00> : vector<128x128xf32>
    %15 = tpu.matmul %8, %14, %cst {dimension_numbers = #tpu.dot_dimension_numbers<[0], [0], [1], [1], [0, 1, 1, 1], [], []>} : vector<24x128xf32>, vector<24x128xf32>, vector<128x128xf32> -> vector<128x128xf32>
    %c0_6 = arith.constant 0 : index
    %c0_7 = arith.constant 0 : index
    %16 = vector.load %arg8[%c0_6, %c0_7] : memref<24x128xf32, #tpu.memory_space<vmem>>, vector<24x128xf32>
    %cst_8 = arith.constant dense<0.000000e+00> : vector<24x128xf32>
    %17 = tpu.matmul %13, %15, %cst_8 {dimension_numbers = #tpu.dot_dimension_numbers<[1], [0], [0], [1], [0, 0, 1, 1], [], []>} : vector<24x128xf32>, vector<128x128xf32>, vector<24x128xf32> -> vector<24x128xf32>
    %18 = arith.addf %16, %17 : vector<24x128xf32>
    %c0_9 = arith.constant 0 : index
    %c0_10 = arith.constant 0 : index
    %19 = vector.load %arg8[%c0_9, %c0_10] : memref<24x128xf32, #tpu.memory_space<vmem>>, vector<24x128xf32>
    tpu.vector_store %arg8[%c0_9, %c0_10], %18 {strides = array<i32>} : memref<24x128xf32, #tpu.memory_space<vmem>>, vector<24x128xf32>,
    %c2_i32 = arith.constant 2 : i32
    %20 = arith.cmpi eq, %arg0, %c2_i32 : i32
    %21 = arith.extui %20 : i1 to i32
    %c0_i32_11 = arith.constant 0 : i32
    %22 = arith.cmpi ne, %21, %c0_i32_11 : i32
    scf.if %22 {
      %c0_12 = arith.constant 0 : index
      %c32 = arith.constant 32 : index
      %23 = vector.load %arg8[%c0_12, %c32] : memref<24x128xf32, #tpu.memory_space<vmem>>, vector<24x1xf32>
      %cst_13 = arith.constant 1.000000e+00 : f32
      %24 = vector.broadcast %cst_13 : f32 to vector<24x1xf32>
      %25 = arith.maximumf %23, %24 : vector<24x1xf32>
      %26 = tpu.reciprocal %25 : vector<24x1xf32> -> vector<24x1xf32>
      %c0_14 = arith.constant 0 : index
      %c0_15 = arith.constant 0 : index
      %27 = vector.load %arg8[%c0_14, %c0_15] : memref<24x128xf32, #tpu.memory_space<vmem>>, vector<24x128xf32>
      %28 = vector.broadcast %26 : vector<24x1xf32> to vector<24x128xf32>
      %29 = arith.mulf %27, %28 : vector<24x128xf32>
      %c0_16 = arith.constant 0 : index
      %c0_17 = arith.constant 0 : index
      %30 = vector.load %arg4[%c0_16, %c0_17] : memref<128x128xf32, #tpu.memory_space<vmem>>, vector<128x128xf32>
      %cst_18 = arith.constant dense<0.000000e+00> : vector<24x128xf32>
      %31 = tpu.matmul %29, %30, %cst_18 {dimension_numbers = #tpu.dot_dimension_numbers<[1], [0], [0], [1], [0, 0, 1, 1], [], []>} : vector<24x128xf32>, vector<128x128xf32>, vector<24x128xf32> -> vector<24x128xf32>
      %c0_19 = arith.constant 0 : index
      %c0_20 = arith.constant 0 : index
      %32 = vector.load %arg3[%c0_19, %c0_20] : memref<24x128xf32, #tpu.memory_space<vmem>>, vector<24x128xf32>
      %c0_21 = arith.constant 0 : index
      %c0_22 = arith.constant 0 : index
      %33 = vector.load %arg5[%c0_21, %c0_22] : memref<128x128xf32, #tpu.memory_space<vmem>>, vector<128x128xf32>
      %cst_23 = arith.constant dense<0.000000e+00> : vector<24x128xf32>
      %34 = tpu.matmul %32, %33, %cst_23 {dimension_numbers = #tpu.dot_dimension_numbers<[1], [0], [0], [1], [0, 0, 1, 1], [], []>} : vector<24x128xf32>, vector<128x128xf32>, vector<24x128xf32> -> vector<24x128xf32>
      %35 = arith.addf %31, %34 : vector<24x128xf32>
      %c0_24 = arith.constant 0 : index
      %c0_25 = arith.constant 0 : index
      %36 = vector.load %arg6[%c0_24, %c0_25] : memref<1x128xf32, #tpu.memory_space<vmem>>, vector<1x128xf32>
      %37 = vector.broadcast %36 : vector<1x128xf32> to vector<24x128xf32>
      %38 = arith.addf %35, %37 : vector<24x128xf32>
      %c0_26 = arith.constant 0 : index
      %c0_27 = arith.constant 0 : index
      %39 = vector.load %arg7[%c0_26, %c0_27] : memref<24x128xf32, #tpu.memory_space<vmem>>, vector<24x128xf32>
      tpu.vector_store %arg7[%c0_26, %c0_27], %38 {strides = array<i32>} : memref<24x128xf32, #tpu.memory_space<vmem>>, vector<24x128xf32>,
    } else {
    }
    return
  }
  func.func @transform_0(%arg0: i32) -> (i32, i32) {
    %c0_i32 = arith.constant 0 : i32
    %c0_i32_0 = arith.constant 0 : i32
    return %c0_i32, %arg0 : i32, i32
  }
  func.func @transform_1(%arg0: i32) -> (i32, i32) {
    %c0_i32 = arith.constant 0 : i32
    %c0_i32_0 = arith.constant 0 : i32
    return %c0_i32, %arg0 : i32, i32
  }
  func.func @transform_2(%arg0: i32) -> (i32, i32) {
    %c0_i32 = arith.constant 0 : i32
    %c0_i32_0 = arith.constant 0 : i32
    %c0_i32_1 = arith.constant 0 : i32
    return %c0_i32, %c0_i32_0 : i32, i32
  }
  func.func @transform_3(%arg0: i32) -> (i32, i32) {
    %c0_i32 = arith.constant 0 : i32
    %c0_i32_0 = arith.constant 0 : i32
    %c0_i32_1 = arith.constant 0 : i32
    return %c0_i32, %c0_i32_0 : i32, i32
  }
  func.func @transform_4(%arg0: i32) -> (i32, i32) {
    %c0_i32 = arith.constant 0 : i32
    %c0_i32_0 = arith.constant 0 : i32
    %c0_i32_1 = arith.constant 0 : i32
    return %c0_i32, %c0_i32_0 : i32, i32
  }
  func.func @transform_5(%arg0: i32) -> (i32, i32) {
    %c0_i32 = arith.constant 0 : i32
    %c0_i32_0 = arith.constant 0 : i32
    %c0_i32_1 = arith.constant 0 : i32
    return %c0_i32, %c0_i32_0 : i32, i32
  }
  func.func @transform_6(%arg0: i32) -> (i32, i32) {
    %c0_i32 = arith.constant 0 : i32
    %c0_i32_0 = arith.constant 0 : i32
    %c0_i32_1 = arith.constant 0 : i32
    return %c0_i32, %c0_i32_0 : i32, i32
  }
}

</mosaic_0001>

<bundles_post_ra>
// kernel: tpu_custom_call.1
= control target key start
LH: loop header
LB: loop body
LE: loop exit
PB: predicated region body
PF: predicated region fallthrough
CT: control target
= control target key end

     0   :  { %s1581_s0 = inlined_call_operand.hbm [shape: s32[1,384], index: 0, kind: input, shape index: {}]   ;;  %s1582_s1 = inlined_call_operand.hbm [shape: s32[1,384], index: 1, kind: input, shape index: {}]   ;;  %s1583_s2 = inlined_call_operand.hbm [shape: f32[24,128], index: 2, kind: input, shape index: {}]   ;;  %s1584_s3 = inlined_call_operand.hbm [shape: f32[128,128], index: 3, kind: input, shape index: {}]   ;;  %s1585_s4 = inlined_call_operand.hbm [shape: f32[128,128], index: 4, kind: input, shape index: {}]   ;;  %s1586_s5 = inlined_call_operand.vmem [shape: f32[1,128], index: 5, kind: input, shape index: {}]   ;;  %s1587_s6 = inlined_call_operand.hbm [shape: f32[24,128], index: 6, kind: output, shape index: {}]  }
   0x1   :  { %1588 = sst [smem:[#allocation18_spill]] %s1583_s2 }
   0x2   :  { %11 = vsyncpa [#allocation4], 0 }
   0x3   :  { %13 = vsyncpa [#allocation4 + $0x1], 0 }
   0x4   :  { %14 = vsyncpa [#allocation7], 0 }
   0x5   :  { %16 = vsyncpa [#allocation7 + $0x1], 0 }
   0x6   :  { %17 = vsyncpa [#allocation10], 0 }
   0x7   :  { %18 = vsyncpa [#allocation5], 0  ;;  %s1298_s21 = smov 0   ;;  %s1300_s22 = smov 0  }
   0x8   :  { %s1302_s23 = smov 0   ;;  %s1304_s24 = smov 0  }
   0x9 LB: > { %s1589_s2 = sld [smem:[#allocation18_spill]]  ;;  %s1322_s28 = sadd.s32 4294967295, %s1249_s24   ;;  %s1249_s24 = sphi %s1304_s24, %s1605_s24   ;;  %s1245_s23 = sphi %s1302_s23, %s1604_s23   ;;  %s1241_s22 = sphi %s1300_s22, %s1603_s22   ;;  %s1237_s21 = sphi %s1298_s21, %s1602_s21  }
   0xa   : > { %p826_p0 = scmp.ge.s32.totalorder %s1249_s24, 1  ;;  %p45_p1 = scmp.eq.s32.totalorder %s1322_s28, 0 }
   0xb   : > { %p186_p2 = scmp.lt.s32.totalorder %s1249_s24, 4  ;;  %p827_p3 = scmp.ne.s32.totalorder %s1322_s28, 0 }
   0xc   : > { %s1251_s30 = smov [#allocation8]   ;;  %s211_s10 = sshll.u32 %s1584_s3, 4  ;;  %s212_s10 = int_to_ptr.hbm [resolvable:$true] %s211_s10 }
   0xd   : > { %p1328_p4 = pnand %p826_p0, %p186_p2  ;;  %s199_s7 = sshll.u32 %s1251_s30, 4  ;;  %s200_s7 = int_to_ptr.vmem [resolvable:$true] %s199_s7 }
   0xe   : > { %s225_s14 = sshll.u32 %s1585_s4, 4  ;;  %s1252_s15 = smov [#allocation9]   ;;  %s226_s14 = int_to_ptr.hbm [resolvable:$true] %s225_s14 }
   0xf   : > { %s197_s27 = sshll.u32 %s1589_s2, 4  ;;  %p940_p5 = pneg %p1328_p4  ;;  %s198_s27 = int_to_ptr.hbm [resolvable:$true] %s197_s27 }
  0x10   : > { %s213_s16 = sshll.u32 %s1252_s15, 4  ;;  %s1253_s17 = smov 128   ;;  %s214_s16 = int_to_ptr.vmem [resolvable:$true] %s213_s16 }
  0x11   : > { %p1339_p6 = pnand %p940_p5, %p45_p1  ;;  %s1254_s18 = smov 8  }
  0x12   : > { %s1255_s19 = smov [#allocation11]   ;;  %s1353_s25 = sadd.s32 1, %s1249_s24  }
  0x13   : > { %943 = dma.hbm_to_vmem [thread:$0]  (!%p1339_p6), %s198_s27, 384, %s200_s7, [#allocation7], %s1253_s17, %s1253_s17, %s1254_s18  }
  0x14   : > { %946 = dma.hbm_to_vmem [thread:$0]  (!%p1339_p6), %s212_s10, 2048, %s214_s16, [#allocation10], %s1253_s17, %s1253_s17, %s1254_s18  }
  0x15   : > { %s227_s20 = sshll.u32 %s1255_s19, 4  ;;  %s28_s26 = ssub.s32 %s1249_s24, %s1353_s25  ;;  %s228_s20 = int_to_ptr.vmem [resolvable:$true] %s227_s20 }
  0x16   : > { %949 = dma.hbm_to_vmem [thread:$0]  (!%p1339_p6), %s226_s14, 2048, %s228_s20, [#allocation10], %s1253_s17, %s1253_s17, %s1254_s18  }
  0x17   : > { %s31_s30 = sadd.s32 1, %s1245_s23  ;;  %p29_p7 = scmp.eq.s32.totalorder %s28_s26, 0 }
  0x18   : > { %p38_p8 = scmp.ne.s32.totalorder %s1245_s23, %s1241_s22  ;;  %p39_p9 = scmp.eq.s32.totalorder %s1249_s24, 0 }
  0x19   : > { %p44_p10 = scmp.ne.s32.totalorder %s1241_s22, %s1237_s21  ;;  %p960_p13 = scmp.lt.s32.totalorder %s1249_s24, 3 }
  0x1a   : > { %s1364_s27 = scalar_select %p29_p7, %s1245_s23, %s31_s30  }
  0x1b   : > { %p40_p11 = por %p39_p9, %p38_p8  ;;  %p1368_p12 = por %p45_p1, %p44_p10 }
  0x1c   : > { %s244_s8 = sand.u32 1, %s1245_s23   ;;  %s250_s11 = scalar_lea.hbm %s1581_s0, %s1249_s24 }
  0x1d   : > { %s247_s12 = scalar_lea.vmem [#allocation3], %s244_s8  ;;  %s252_s14 = sshll.u32 %s250_s11, 4  ;;  %s253_s14 = int_to_ptr.hbm [resolvable:$true] %s252_s14 }
  0x1e   : > { %s254_s13 = sshll.u32 %s247_s12, 4  ;;  %p1378_p0 = pnand %p960_p13, %p40_p11  ;;  %s255_s13 = int_to_ptr.vmem [resolvable:$true] %s254_s13 }
  0x1f   : > { %s261_s15 = sand.u32 1, %s1249_s24   ;;  %s245_s16 = scalar_lea.sflag [#allocation4], %s244_s8 }
  0x20   : > { %s1111_s17 = sshra.s32 %s253_s14, 4  ;;  %p1115_p5 = pneg %p1378_p0  ;;  %s1112_s17 = int_to_ptr.hbm [resolvable:$true] %s1111_s17 }
  0x21   : > { %s1113_s18 = scalar_lea.hbm %s1112_s17, 1  ;;  %s1118_s26 = scalar_lea.hbm %s1581_s0, 3 }
  0x22   : > { %p1114_p2 = scmp.ne.s32.totalorder %s1112_s17, %s1113_s18  ;;  %p1119_p8 = scmp.lt.s32.totalorder %s1112_s17, %s1581_s0 }
  0x23   : > { %p1120_p9 = scmp.lt.s32.totalorder %s1118_s26, %s1113_s18 }
  0x24   : > { %p1116_p6 = pnand %p1115_p5, %p1114_p2 }
  0x25   : > { %p1121_p10 = por %p1120_p9, %p1119_p8 }
  0x26   : > { %p1117_p7 = pneg %p1116_p6 }
  0x28   : > { %p1122_p11 = pnand %p1121_p10, %p1117_p7 }
  0x2a   : > { %1125 = shalt.err (!%p1122_p11)
}
  0x2b   : > { %953 = dma.hbm_to_vmem [thread:$0]  (!%p1378_p0), %s253_s14, 16, %s255_s13, %s245_s16  }
  0x2c   : > { %s267_s12 = scalar_lea.hbm %s1582_s1, %s1249_s24  ;;  %s264_s2 = scalar_lea.vmem [#allocation6], %s244_s8 }
  0x2d   : > { %s271_s19 = sshll.u32 %s264_s2, 4  ;;  %s269_s20 = sshll.u32 %s267_s12, 4  ;;  %s272_s19 = int_to_ptr.vmem [resolvable:$true] %s271_s19  ;;  %s270_s20 = int_to_ptr.hbm [resolvable:$true] %s269_s20 }
  0x2e   : > { %s262_s30 = scalar_lea.sflag [#allocation7], %s261_s15  ;;  %s1141_s17 = sshra.s32 %s270_s20, 4  ;;  %s1142_s17 = int_to_ptr.hbm [resolvable:$true] %s1141_s17 }
  0x2f   : > { %s1143_s18 = scalar_lea.hbm %s1142_s17, 1  ;;  %s1148_s14 = scalar_lea.hbm %s1582_s1, 3 }
  0x30   : > { %p1144_p13 = scmp.ne.s32.totalorder %s1142_s17, %s1143_s18  ;;  %p1149_p7 = scmp.lt.s32.totalorder %s1142_s17, %s1582_s1 }
  0x31   : > { %p1150_p8 = scmp.lt.s32.totalorder %s1148_s14, %s1143_s18 }
  0x32   : > { %p1146_p2 = pnand %p1144_p13, %p1115_p5 }
  0x33   : > { %p1151_p9 = por %p1150_p8, %p1149_p7 }
  0x34   : > { %p1147_p6 = pneg %p1146_p2 }
  0x36   : > { %p1152_p10 = pnand %p1151_p9, %p1147_p6 }
  0x38   : > { %1155 = shalt.err (!%p1152_p10)
}
  0x39   : > { %956 = dma.hbm_to_vmem [thread:$0]  (!%p1378_p0), %s270_s20, 16, %s272_s19, %s262_s30  }
  0x3a   : > { %280 = sbr.rel (%p1328_p4) target bundleno = 965 (0x3c5), region = 44  ;;  %s1414_s2 = sand.u32 (!%p1328_p4), 1, %s1241_s22  }
  0x3b   : > { %s283_s8 = scalar_lea.sflag (!%p1328_p4), [#allocation4], %s1414_s2  ;;  %s285_s15 = scalar_lea.vmem (!%p1328_p4), [#allocation3], %s1414_s2 }
  0x3f   : > { %1216 = dma.done.wait (%p1368_p12), %s283_s8, 16  }
  0x40   : > { %1218 = vsyncadd (%p1368_p12), %s283_s8, 4294967280  ;;  %s291_s21 = sand.u32 1, %s1322_s28   ;;  %s294_s29 = scalar_lea.vmem [#allocation6], %s1414_s2 }
  0x41   : > { %s292_s9 = scalar_lea.sflag [#allocation7], %s291_s21 }
  0x42   : > { %1220 = dma.done.wait (%p1368_p12), %s292_s9, 16  }
  0x43   : > { %1222 = vsyncadd (%p1368_p12), %s292_s9, 4294967280 }
  0x44   : > { %1224 = dma.done.wait (%p45_p1), [#allocation7], 384  }
  0x45   : > { %1226 = vsyncadd (%p45_p1), [#allocation7], 4294966912 }
  0x46   : > { %1228 = dma.done.wait (%p45_p1), [#allocation10], 4096  }
  0x47   : > { %1230 = vsyncadd (%p45_p1), [#allocation10], 4294963200  ;;  %340 = sbr.rel (%p827_p3) target bundleno = 80 (0x50), region = 68 }
  0x4c   : > { %v1256_v0 = vmov 0.0  }
  0x4d   : > { %341 = vst [vmem:[#allocation2 + $0x10] sm:$0xff] %v1256_v0 }
  0x4e   : > { %342 = vst [vmem:[#allocation2] sm:$0xff] %v1256_v0 }
  0x4f   : > { %343 = vst [vmem:[#allocation2 + $0x8] sm:$0xff] %v1256_v0 }
  0x50 PF: > { %v344_v1 = vlaneseq  ;;  %v1010_v2 = vld [vmem:[%s285_s15] ss:$0 sm:$0xff]  ;;  %v372_v3 = vld [vmem:[#allocation8 + $0x10] sm:$0xff]  ;;  %v371_v4 = vld [vmem:[#allocation8 + $0x8] sm:$0xff]  ;;  %v1257_v8 = vmov 0.0   ;;  %vm405_vm3 = vcmask 195584  }
  0x51   : > { %467 = vmatpush.msra.mxu0 %v372_v3  ;;  %866 = vmatpush.msra.mxu2 %v372_v3  ;;  %v370_v6 = vld [vmem:[#allocation8] sm:$0xff]  ;;  %v1258_v46 = vmov 1.0   ;;  %p861_p1 = scmp.ne.s32.totalorder %s1322_s28, 2 }
  0x52   : > { %v1438_v5 = vshrl.u32 %v344_v1, 7  ;;  %867 = vmatpush.msra.mxu3 %v372_v3  ;;  %v1011_v45 = vld [vmem:[%s294_s29] ss:$0 sm:$0xff] }
  0x53   : > { %468 = vmatpush.msra.mxu0 %v371_v4  ;;  %868 = vmatpush.msra.mxu2 %v371_v4 }
  0x54   : > { %vm350_vm0 = vcmp.eq.s32.totalorder %v1010_v2, %v1438_v5  ;;  %v1442_v7 = vadd.s32 8, %v1438_v5  ;;  %869 = vmatpush.msra.mxu3 %v371_v4  ;;  %v1446_v11 = vadd.s32 16, %v1438_v5  ;;  %vm361_vm5 = vcmp.eq.s32.totalorder %v1011_v45, %v1438_v5  ;;  %v519_v47 = vld [vmem:[#allocation2 + $0x10] sm:$0xff] }
  0x55   : > { %v836_v9 = vsel %vm350_vm0, 1.0, %v1257_v8  ;;  %469 = vmatpush.msra.mxu0 %v370_v6  ;;  %870 = vmatpush.msra.mxu2 %v370_v6  ;;  %v520_v50 = vld [vmem:[#allocation2] sm:$0xff] }
  0x56   : > { %373 = vxpose.xlu0.b32.start [1/3] (short) %v836_v9, 128  ;;  %871 = vmatpush.msra.mxu3 %v370_v6  ;;  %vm351_vm1 = vcmp.eq.s32.totalorder %v1010_v2, %v1442_v7  ;;  %vm352_vm2 = vcmp.eq.s32.totalorder %v1010_v2, %v1446_v11  ;;  %vm362_vm4 = vcmp.eq.s32.totalorder %v1011_v45, %v1442_v7  ;;  %v521_v53 = vld [vmem:[#allocation2 + $0x8] sm:$0xff] }
  0x57   : > { %v837_v10 = vsel %vm351_vm1, 1.0, %v1257_v8  ;;  %v838_v12 = vsel %vm352_vm2, 1.0, %v1257_v8  ;;  %vm363_vm6 = vcmp.eq.s32.totalorder %v1011_v45, %v1446_v11 }
  0x5e   : > { %374 = vxpose.xlu0.b32.cont [2/3] (short) %v837_v10, 128 }
  0x66   : > { %375 = vxpose.xlu0.b32.end [3/3] (short) %v838_v12, 128 }
  0xfa   : > { %v389_v13 = vpop.trf.xlu0 }
  0xfb   : > { %842 = vmatmul.msk.f32.vlgmr.msra.gmra.mxu0 %vm405_vm3, %v389_v13 }
 0x102   : > { %v390_v14 = vpop.trf.xlu0 }
 0x103   : > { %843 = vmatmul.msk.f32.gmra.mxu0 %vm405_vm3, %v390_v14 }
 0x10a   : > { %v391_v15 = vpop.trf.xlu0 }
 0x10b   : > { %844 = vmatmul.msk.f32.gmra.mxu0 %vm405_vm3, %v391_v15 }
 0x112   : > { %v392_v16 = vpop.trf.xlu0 }
 0x113   : > { %845 = vmatmul.msk.f32.gmra.mxu0 %vm405_vm3, %v392_v16 }
 0x11a   : > { %v393_v17 = vpop.trf.xlu0 }
 0x11b   : > { %846 = vmatmul.msk.f32.gmra.mxu0 %vm405_vm3, %v393_v17 }
 0x122   : > { %v394_v18 = vpop.trf.xlu0 }
 0x123   : > { %847 = vmatmul.msk.f32.gmra.mxu0 %vm405_vm3, %v394_v18 }
 0x12a   : > { %v395_v19 = vpop.trf.xlu0 }
 0x12b   : > { %848 = vmatmul.msk.f32.vlgmr.msra.gmra.mxu2 %vm405_vm3, %v395_v19 }
 0x132   : > { %v396_v20 = vpop.trf.xlu0 }
 0x133   : > { %849 = vmatmul.msk.f32.gmra.mxu2 %vm405_vm3, %v396_v20 }
 0x13a   : > { %v397_v21 = vpop.trf.xlu0 }
 0x13b   : > { %850 = vmatmul.msk.f32.gmra.mxu2 %vm405_vm3, %v397_v21 }
 0x142   : > { %v398_v22 = vpop.trf.xlu0 }
 0x143   : > { %851 = vmatmul.msk.f32.gmra.mxu2 %vm405_vm3, %v398_v22 }
 0x14a   : > { %v399_v23 = vpop.trf.xlu0 }
 0x14b   : > { %852 = vmatmul.msk.f32.gmra.mxu2 %vm405_vm3, %v399_v23 }
 0x152   : > { %v400_v24 = vpop.trf.xlu0 }
 0x153   : > { %853 = vmatmul.msk.f32.gmra.mxu2 %vm405_vm3, %v400_v24 }
 0x15a   : > { %v401_v25 = vpop.trf.xlu0 }
 0x15b   : > { %854 = vmatmul.msk.f32.vlgmr.msra.gmra.mxu3 %vm405_vm3, %v401_v25 }
 0x162   : > { %v402_v26 = vpop.trf.xlu0 }
 0x163   : > { %855 = vmatmul.msk.f32.gmra.mxu3 %vm405_vm3, %v402_v26 }
 0x16a   : > { %v403_v27 = vpop.trf.xlu0 }
 0x16b   : > { %856 = vmatmul.msk.f32.gmra.mxu3 %vm405_vm3, %v403_v27 }
 0x172   : > { %v404_v28 = vpop.trf.xlu0 }
 0x173   : > { %857 = vmatmul.msk.f32.gmra.mxu3 %vm405_vm3, %v404_v28 }
 0x178   : > { %v471_v31 = vpop.f32.mrf.mxu0 }
 0x180   : > { %v474_v34 = vpop.f32.mrf.mxu0 }
 0x188   : > { %v477_v37 = vpop.f32.mrf.mxu0 }
 0x190   : > { %v480_v40 = vpop.f32.mrf.mxu0 }
 0x198   : > { %v483_v43 = vpop.f32.mrf.mxu0 }
 0x1a0   : > { %v486_v44 = vpop.f32.mrf.mxu0 }
 0x1ae   : > { %v489_v29 = vpop.f32.mrf.mxu2 }
 0x1b6   : > { %v492_v30 = vpop.f32.mrf.mxu2 }
 0x1be   : > { %v495_v33 = vpop.f32.mrf.mxu2 }
 0x1c6   : > { %v498_v36 = vpop.f32.mrf.mxu2 }
 0x1ce   : > { %v501_v39 = vpop.f32.mrf.mxu2 }
 0x1d6   : > { %v504_v42 = vpop.f32.mrf.mxu2 }
 0x1de   : > { %v507_v32 = vpop.f32.mrf.mxu3 }
 0x1e6   : > { %v510_v35 = vpop.f32.mrf.mxu3 }
 0x1ee   : > { %v513_v38 = vpop.f32.mrf.mxu3 }
 0x1f6   : > { %v516_v41 = vpop.f32.mrf.mxu3 }
 0x1f7   : > { %522 = vmatpush.msra.mxu1 %v516_v41  ;;  %872 = vmatpush.msrb.mxu3 %v516_v41 }
 0x1f9   : > { %523 = vmatpush.msra.mxu1 %v513_v38  ;;  %873 = vmatpush.msrb.mxu3 %v513_v38 }
 0x1fb   : > { %524 = vmatpush.msra.mxu1 %v510_v35  ;;  %874 = vmatpush.msrb.mxu3 %v510_v35 }
 0x1fd   : > { %525 = vmatpush.msra.mxu1 %v507_v32  ;;  %875 = vmatpush.msrb.mxu3 %v507_v32 }
 0x1ff   : > { %526 = vmatpush.msra.mxu1 %v504_v42  ;;  %876 = vmatpush.msrb.mxu3 %v504_v42 }
 0x201   : > { %527 = vmatpush.msra.mxu1 %v501_v39  ;;  %877 = vmatpush.msrb.mxu3 %v501_v39 }
 0x203   : > { %528 = vmatpush.msra.mxu1 %v498_v36  ;;  %878 = vmatpush.msrb.mxu3 %v498_v36 }
 0x205   : > { %529 = vmatpush.msra.mxu1 %v495_v33  ;;  %879 = vmatpush.msrb.mxu3 %v495_v33 }
 0x207   : > { %530 = vmatpush.msra.mxu1 %v492_v30  ;;  %880 = vmatpush.msrb.mxu3 %v492_v30 }
 0x209   : > { %531 = vmatpush.msra.mxu1 %v489_v29  ;;  %881 = vmatpush.msrb.mxu3 %v489_v29 }
 0x20b   : > { %532 = vmatpush.msra.mxu1 %v486_v44  ;;  %882 = vmatpush.msrb.mxu3 %v486_v44 }
 0x20d   : > { %533 = vmatpush.msra.mxu1 %v483_v43  ;;  %883 = vmatpush.msrb.mxu3 %v483_v43 }
 0x20f   : > { %534 = vmatpush.msra.mxu1 %v480_v40  ;;  %884 = vmatpush.msrb.mxu3 %v480_v40 }
 0x211   : > { %535 = vmatpush.msra.mxu1 %v477_v37  ;;  %885 = vmatpush.msrb.mxu3 %v477_v37 }
 0x213   : > { %536 = vmatpush.msra.mxu1 %v474_v34  ;;  %886 = vmatpush.msrb.mxu3 %v474_v34 }
 0x215   : > { %537 = vmatpush.msra.mxu1 %v471_v31  ;;  %887 = vmatpush.msrb.mxu3 %v471_v31 }
 0x216   : > { %859 = vmatmul.msk.f32.vlgmr.msrb.gmra.mxu3 %vm362_vm4, %v1258_v46  ;;  %858 = vmatmul.msk.f32.vlgmr.msra.gmra.mxu1 %vm361_vm5, %v1258_v46 }
 0x21e   : > { %860 = vmatmul.msk.f32.gmra.mxu3 %vm363_vm6, %v1258_v46 }
 0x293   : > { %v539_v48 = vpop.f32.mrf.mxu1 }
 0x294   : > { %v548_v49 = vadd.f32 %v539_v48, %v519_v47 }
 0x296   : > { %551 = vst [vmem:[#allocation2 + $0x10] sm:$0xff] %v548_v49 }
 0x299   : > { %v542_v51 = vpop.f32.mrf.mxu3 }
 0x29a   : > { %v549_v52 = vadd.f32 %v542_v51, %v520_v50 }
 0x29c   : > { %552 = vst [vmem:[#allocation2] sm:$0xff] %v549_v52 }
 0x2a0   : > { %557 = sbr.rel (%p861_p1) target bundleno = 959 (0x3bf), region = 72 }
 0x2a1   : > { %v545_v54 = vpop.f32.mrf.mxu3 }
 0x2a2   : > { %v550_v55 = vadd.f32 %v545_v54, %v521_v53 }
 0x2a4   : > { %553 = vst [vmem:[#allocation2 + $0x8] sm:$0xff] %v550_v55 }
 0x2a5   : > { %v1471_v56 = vld [vmem:[#allocation2] sm:$0xff]  ;;  %v1475_v58 = vld [vmem:[#allocation2 + $0x10] sm:$0xff]  ;;  %v1259_v59 = vmov 32  }
 0x2a6   : > { %1012 = vset.pattern.permute.xlu0 %v1259_v59  ;;  %v1478_v60 = vmax.f32 %v1471_v56, 1.0  ;;  %1013 = vset.pattern.permute.xlu1 %v1259_v59  ;;  %v1484_v62 = vmax.f32 %v1475_v58, 1.0  ;;  %v658_v63 = vld [vmem:[#allocation11 + $0x78] sm:$0xff]  ;;  %v657_v1 = vld [vmem:[#allocation11 + $0x70] sm:$0xff]  ;;  %v656_v3 = vld [vmem:[#allocation11 + $0x68] sm:$0xff] }
 0x2a7   : > { %v639_v0 = vld [vmem:[#allocation9 + $0x78] sm:$0xff]  ;;  %888 = vmatpush.msra.mxu2 %v658_v63  ;;  %v638_v2 = vld [vmem:[#allocation9 + $0x70] sm:$0xff]  ;;  %v637_v4 = vld [vmem:[#allocation9 + $0x68] sm:$0xff]  ;;  %659 = vmatpush.msra.mxu0 %v658_v63 }
 0x2a8   : > { %904 = vmatpush.msra.mxu3 %v639_v0  ;;  %1015 = vrcp.f32 %v1478_v60  ;;  %685 = vmatpush.msra.mxu1 %v639_v0  ;;  %v655_v5 = vld [vmem:[#allocation11 + $0x60] sm:$0xff]  ;;  %v654_v7 = vld [vmem:[#allocation11 + $0x58] sm:$0xff]  ;;  %v653_v10 = vld [vmem:[#allocation11 + $0x50] sm:$0xff]  ;;  %vm583_vm7 = vweird.f32 %v1478_v60  ;;  %v589_v15 = vand.u32 2147483648, %v1478_v60  ;;  %v587_v20 = vand.u32 2147483647, %v1478_v60 }
 0x2a9   : > { %889 = vmatpush.msra.mxu2 %v657_v1  ;;  %v636_v6 = vld [vmem:[#allocation9 + $0x60] sm:$0xff]  ;;  %660 = vmatpush.msra.mxu0 %v657_v1  ;;  %v635_v8 = vld [vmem:[#allocation9 + $0x58] sm:$0xff]  ;;  %v634_v11 = vld [vmem:[#allocation9 + $0x50] sm:$0xff]  ;;  %vm569_vm9 = vweird.f32 %v1484_v62  ;;  %v575_v23 = vand.u32 2147483648, %v1484_v62  ;;  %v573_v28 = vand.u32 2147483647, %v1484_v62 }
 0x2aa   : > { %905 = vmatpush.msra.mxu3 %v638_v2  ;;  %686 = vmatpush.msra.mxu1 %v638_v2  ;;  %v652_v17 = vld [vmem:[#allocation11 + $0x48] sm:$0xff]  ;;  %v651_v24 = vld [vmem:[#allocation11 + $0x40] sm:$0xff]  ;;  %v590_v30 = vor.u32 1.1754944e-38, %v589_v15  ;;  %v650_v32 = vld [vmem:[#allocation11 + $0x38] sm:$0xff]  ;;  %vm1521_vm13 = vcmp.eq.f32.partialorder %v587_v20, 8.507059e+37 }
 0x2ab   : > { %v1473_v57 = vld [vmem:[#allocation2 + $0x8] sm:$0xff]  ;;  %890 = vmatpush.msra.mxu2 %v656_v3  ;;  %661 = vmatpush.msra.mxu0 %v656_v3  ;;  %v633_v18 = vld [vmem:[#allocation9 + $0x48] sm:$0xff]  ;;  %v632_v25 = vld [vmem:[#allocation9 + $0x40] sm:$0xff]  ;;  %v576_v40 = vor.u32 1.1754944e-38, %v575_v23  ;;  %vm574_vm0 = vcmp.eq.f32.partialorder %v573_v28, 8.507059e+37 }
 0x2ac   : > { %v1481_v61 = vmax.f32 %v1473_v57, 1.0  ;;  %906 = vmatpush.msra.mxu3 %v637_v4  ;;  %687 = vmatpush.msra.mxu1 %v637_v4  ;;  %v631_v33 = vld [vmem:[#allocation9 + $0x38] sm:$0xff]  ;;  %v649_v41 = vld [vmem:[#allocation11 + $0x30] sm:$0xff]  ;;  %v648_v48 = vld [vmem:[#allocation11 + $0x28] sm:$0xff] }
 0x2ad   : > { %891 = vmatpush.msra.mxu2 %v655_v5  ;;  %662 = vmatpush.msra.mxu0 %v655_v5  ;;  %v630_v45 = vld [vmem:[#allocation9 + $0x30] sm:$0xff]  ;;  %v629_v50 = vld [vmem:[#allocation9 + $0x28] sm:$0xff]  ;;  %v647_v53 = vld [vmem:[#allocation11 + $0x20] sm:$0xff] }
 0x2ae   : > { %1017 = vrcp.f32 %v1481_v61  ;;  %907 = vmatpush.msra.mxu3 %v636_v6  ;;  %v1489_v9 = vpop.eup %1015  ;;  %688 = vmatpush.msra.mxu1 %v636_v6  ;;  %vm597_vm12 = vweird.f32 %v1481_v61  ;;  %v601_v37 = vand.u32 2147483647, %v1481_v61  ;;  %v603_v38 = vand.u32 2147483648, %v1481_v61  ;;  %v628_v55 = vld [vmem:[#allocation9 + $0x20] sm:$0xff]  ;;  %v646_v59 = vld [vmem:[#allocation11 + $0x18] sm:$0xff]  ;;  %v626_v63 = vld [vmem:[#allocation9 + $0x10] sm:$0xff] }
 0x2af   : > { %1019 = vrcp.f32 %v1484_v62  ;;  %v579_v13 = vmul.f32 %v1489_v9, %v1478_v60  ;;  %892 = vmatpush.msra.mxu2 %v654_v7  ;;  %663 = vmatpush.msra.mxu0 %v654_v7  ;;  %vm584_vm8 = vweird.f32 %v1489_v9  ;;  %v627_v60 = vld [vmem:[#allocation9 + $0x18] sm:$0xff]  ;;  %v644_v0 = vld [vmem:[#allocation11 + $0x8] sm:$0xff]  ;;  %v643_v2 = vld [vmem:[#allocation11] sm:$0xff] }
 0x2b0   : > { %908 = vmatpush.msra.mxu3 %v635_v8  ;;  %689 = vmatpush.msra.mxu1 %v635_v8  ;;  %vm1514_vm11 = vmor %vm583_vm7, %vm584_vm8  ;;  %v604_v51 = vor.u32 1.1754944e-38, %v603_v38  ;;  %vm602_vm2 = vcmp.eq.f32.partialorder %v601_v37, 8.507059e+37  ;;  %v625_v1 = vld [vmem:[#allocation9 + $0x8] sm:$0xff]  ;;  %v624_v3 = vld [vmem:[#allocation9] sm:$0xff] }
 0x2b1   : > { %v580_v19 = vsub.f32 1.0, %v579_v13  ;;  %893 = vmatpush.msra.mxu2 %v653_v10  ;;  %664 = vmatpush.msra.mxu0 %v653_v10  ;;  %v641_v4 = vld [vmem:[#allocation8 + $0x8] sm:$0xff]  ;;  %v642_v5 = vld [vmem:[#allocation8 + $0x10] sm:$0xff]  ;;  %v640_v6 = vld [vmem:[#allocation8] sm:$0xff] }
 0x2b2   : > { %909 = vmatpush.msra.mxu3 %v634_v11  ;;  %690 = vmatpush.msra.mxu1 %v634_v11 }
 0x2b3   : > { %v581_v26 = vmul.f32 %v1489_v9, %v580_v19  ;;  %894 = vmatpush.msra.mxu2 %v652_v17  ;;  %665 = vmatpush.msra.mxu0 %v652_v17 }
 0x2b4   : > { %v1491_v12 = vpop.eup %1017  ;;  %910 = vmatpush.msra.mxu3 %v633_v18  ;;  %691 = vmatpush.msra.mxu1 %v633_v18 }
 0x2b5   : > { %v1495_v14 = vpop.eup %1019  ;;  %v593_v16 = vmul.f32 %v1491_v12, %v1481_v61  ;;  %v582_v34 = vadd.f32 %v1489_v9, %v581_v26  ;;  %vm598_vm14 = vweird.f32 %v1491_v12  ;;  %895 = vmatpush.msra.mxu2 %v651_v24  ;;  %666 = vmatpush.msra.mxu0 %v651_v24 }
 0x2b6   : > { %v565_v21 = vmul.f32 %v1495_v14, %v1484_v62  ;;  %vm570_vm10 = vweird.f32 %v1495_v14  ;;  %911 = vmatpush.msra.mxu3 %v632_v25  ;;  %692 = vmatpush.msra.mxu1 %v632_v25  ;;  %vm1548_vm1 = vmor %vm597_vm12, %vm598_vm14  ;;  %v645_v62 = vld [vmem:[#allocation11 + $0x10] sm:$0xff] }
 0x2b7   : > { %v594_v22 = vsub.f32 1.0, %v593_v16  ;;  %vm1533_vm15 = vmor %vm569_vm9, %vm570_vm10  ;;  %v586_v42 = vsel %vm1514_vm11, %v1489_v9, %v582_v34  ;;  %896 = vmatpush.msra.mxu2 %v650_v32  ;;  %667 = vmatpush.msra.mxu0 %v650_v32  ;;  %v1014_v16 = vld [vmem:[%s1586_s5] ss:$0 sm:$0xff] }
 0x2b8   : > { %v566_v27 = vsub.f32 1.0, %v565_v21  ;;  %912 = vmatpush.msra.mxu3 %v631_v33  ;;  %v591_v46 = vsel %vm1521_vm13, %v590_v30, %v586_v42  ;;  %693 = vmatpush.msra.mxu1 %v631_v33 }
 0x2b9   : > { %v595_v31 = vmul.f32 %v1491_v12, %v594_v22  ;;  %613 = vperm.xlu0 %1012, %v591_v46   ;;  %897 = vmatpush.msra.mxu2 %v649_v41 }
 0x2ba   : > { %v567_v36 = vmul.f32 %v1495_v14, %v566_v27  ;;  %913 = vmatpush.msra.mxu3 %v630_v45  ;;  %668 = vmatpush.msra.mxu0 %v649_v41 }
 0x2bb   : > { %v596_v43 = vadd.f32 %v1491_v12, %v595_v31  ;;  %898 = vmatpush.msra.mxu2 %v648_v48  ;;  %694 = vmatpush.msra.mxu1 %v630_v45 }
 0x2bc   : > { %v568_v44 = vadd.f32 %v1495_v14, %v567_v36  ;;  %914 = vmatpush.msra.mxu3 %v629_v50  ;;  %669 = vmatpush.msra.mxu0 %v648_v48 }
 0x2bd   : > { %v600_v54 = vsel %vm1548_vm1, %v1491_v12, %v596_v43  ;;  %899 = vmatpush.msra.mxu2 %v647_v53  ;;  %695 = vmatpush.msra.mxu1 %v629_v50 }
 0x2be   : > { %v572_v49 = vsel %vm1533_vm15, %v1495_v14, %v568_v44  ;;  %v605_v61 = vsel %vm602_vm2, %v604_v51, %v600_v54  ;;  %915 = vmatpush.msra.mxu3 %v628_v55  ;;  %670 = vmatpush.msra.mxu0 %v647_v53 }
 0x2bf   : > { %v577_v52 = vsel %vm574_vm0, %v576_v40, %v572_v49  ;;  %900 = vmatpush.msra.mxu2 %v646_v59  ;;  %696 = vmatpush.msra.mxu1 %v628_v55 }
 0x2c0   : > { %608 = vperm.xlu1 %1013, %v577_v52   ;;  %916 = vmatpush.msra.mxu3 %v627_v60 }
 0x2c1   : > { %618 = vperm.xlu0 %1012, %v605_v61   ;;  %901 = vmatpush.msra.mxu2 %v645_v62 }
 0x2c2   : > { %917 = vmatpush.msra.mxu3 %v626_v63  ;;  %671 = vmatpush.msra.mxu0 %v646_v59 }
 0x2c3   : > { %902 = vmatpush.msra.mxu2 %v644_v0  ;;  %697 = vmatpush.msra.mxu1 %v627_v60 }
 0x2c4   : > { %918 = vmatpush.msra.mxu3 %v625_v1  ;;  %672 = vmatpush.msra.mxu0 %v645_v62 }
 0x2c5   : > { %698 = vmatpush.msra.mxu1 %v626_v63  ;;  %903 = vmatpush.msra.mxu2 %v643_v2 }
 0x2c6   : > { %673 = vmatpush.msra.mxu0 %v644_v0  ;;  %919 = vmatpush.msra.mxu3 %v624_v3 }
 0x2c7   : > { %699 = vmatpush.msra.mxu1 %v625_v1  ;;  %678 = vmatmul.f32.vlgmr.msra.gmra.mxu2 %v641_v4 }
 0x2c8   : > { %674 = vmatpush.msra.mxu0 %v643_v2 }
 0x2c9   : > { %700 = vmatpush.msra.mxu1 %v624_v3  ;;  %675 = vmatmul.f32.vlgmr.msra.gmra.mxu0 %v640_v6 }
 0x2cf   : > { %681 = vmatmul.f32.gmra.mxu2 %v642_v5 }
 0x32b   : > { %v614_v7 = vpop.permute.xlu0 %613 }
 0x32c   : > { %v622_v8 = vmul.f32 %v614_v7, %v1471_v56 }
 0x32e   : > { %704 = vmatmul.f32.vlgmr.msra.gmra.mxu3 %v622_v8 }
 0x332   : > { %v609_v9 = vpop.permute.xlu1 %608 }
 0x333   : > { %v621_v10 = vmul.f32 %v609_v9, %v1475_v58  ;;  %v619_v11 = vpop.permute.xlu0 %618 }
 0x334   : > { %v623_v12 = vmul.f32 %v619_v11, %v1473_v57 }
 0x335   : > { %701 = vmatmul.f32.vlgmr.msra.gmra.mxu1 %v621_v10 }
 0x336   : > { %707 = vmatmul.f32.gmra.mxu3 %v623_v12 }
 0x346   : > { %v676_v13 = vpop.f32.mrf.mxu0 }
 0x34a   : > { %v679_v14 = vpop.f32.mrf.mxu2 }
 0x352   : > { %v682_v58 = vpop.f32.mrf.mxu2 }
 0x3b1   : > { %v705_v19 = vpop.f32.mrf.mxu3 }
 0x3b2   : > { %v702_v15 = vpop.f32.mrf.mxu1  ;;  %v706_v56 = vadd.f32 %v705_v19, %v679_v14 }
 0x3b3   : > { %v703_v17 = vadd.f32 %v702_v15, %v676_v13 }
 0x3b4   : > { %v716_v20 = vadd.f32 %v1014_v16, %v706_v56 }
 0x3b5   : > { %v715_v18 = vadd.f32 %v1014_v16, %v703_v17 }
 0x3b6   : > { %719 = vst [vmem:[#allocation12 + $0x8] sm:$0xff] %v716_v20 }
 0x3b7   : > { %718 = vst [vmem:[#allocation12] sm:$0xff] %v715_v18 }
 0x3b9   : > { %v708_v21 = vpop.f32.mrf.mxu3 }
 0x3ba   : > { %v709_v22 = vadd.f32 %v708_v21, %v682_v58 }
 0x3bc   : > { %v717_v23 = vadd.f32 %v1014_v16, %v709_v22 }
 0x3be   : > { %720 = vst [vmem:[#allocation12 + $0x10] sm:$0xff] %v717_v23 }
 0x3bf PF: > { %p964_p3 = scmp.eq.s32.totalorder %s1322_s28, 2  ;;  %s1260_s11 = smov [#allocation12]  }
 0x3c0   : > { %s726_s12 = sshll.u32 %s1260_s11, 4  ;;  %s728_s30 = sshll.u32 %s1587_s6, 4  ;;  %s727_s12 = int_to_ptr.vmem [resolvable:$true] %s726_s12  ;;  %s729_s30 = int_to_ptr.hbm [resolvable:$true] %s728_s30 }
 0x3c1   : > { %s1261_s17 = smov 128   ;;  %s1262_s18 = smov 8  }
 0x3c2   : > { %937 = dma.vmem_to_hbm [thread:$0]  (%p964_p3), %s727_s12, 384, %s729_s30, [#allocation5], %s1261_s17, %s1261_s17, %s1262_s18  }
 0x3c3   : > { %1232 = dma.done.wait (%p964_p3), [#allocation5], 384  }
 0x3c4   : > { %1234 = vsyncadd (%p964_p3), [#allocation5], 4294966912 }
 0x3c5 PF: > { %p21_p4 = scmp.ge.s32.totalorder %s1353_s25, 5   ;;  %s1602_s21 = smov %s1241_s22 }
 0x3c6   : > { %s1603_s22 = smov %s1245_s23  ;;  %s1604_s23 = smov %s1364_s27 }
 0x3c7   : > { %s1605_s24 = smov %s1353_s25  ;;  %23 = sbr.rel (!%p21_p4) target bundleno = 9 (0x9), region = 114 }
 0x3cc   :  { %745 = vsyncpa [#allocation4], 1 }
 0x3cd   :  { %747 = vsyncpa [#allocation4 + $0x1], 1 }
 0x3ce   :  { %748 = vsyncpa [#allocation7], 1 }
 0x3cf   :  { %750 = vsyncpa [#allocation7 + $0x1], 1 }
 0x3d0   :  { %751 = vsyncpa [#allocation10], 1 }
 0x3d1   :  { %752 = vsyncpa [#allocation5], 1 }
 0x3d2   :  { %754 = vsyncpa [#allocation5 + $0x1], 1 }

</bundles_post_ra>
